<compile_context>
chip_gen: v6e
topology: v6e:2x2x1
jax: 0.10.0
libtpu: 0.0.40
codegen_flags: <defaults>
</compile_context>

<pallas_src>
import jax
import jax.numpy as jnp
from jax.experimental import pallas as pl
from jax.experimental.pallas import tpu as pltpu

_SMALL_C_MAX = 8  # VPU path for C <= 8, MXU path for larger C (per review)


def _skip_kernel_vpu(x_ref, w_ref, b_ref, o_ref):
    """Small-C path: 1x1 conv as C unrolled VPU FMAs (MXU would be degenerate).

    x_ref/o_ref: (Nb, C, TC)   w_ref: (C, C)   b_ref: (C, 1)
    """
    xf = x_ref[...].astype(jnp.float32)                  # (Nb, C, TC)
    w = w_ref[...].astype(jnp.float32)                   # (C, C)
    c = w.shape[0]
    b_col = b_ref[...].astype(jnp.float32)               # (C, 1) -> bcast (Nb, C, TC)
    # Accumulator starts from the bias fused with the first FMA: no zeros pass.
    acc = b_col + w[:, 0:1] * xf[:, 0:1, :]
    for j in range(1, c):                                 # static unroll, c <= 8
        acc = acc + w[:, j:j + 1] * xf[:, j:j + 1, :]
    y = jnp.maximum(acc, 0.0)                             # ReLU
    o_ref[...] = (xf + y).astype(o_ref.dtype)             # skip connection


def _skip_kernel_mxu(x_ref, w_ref, b_ref, o_ref):
    """Large-C path: contraction on the MXU with f32 accumulation.

    x_ref/o_ref: (Nb, C, TC)   w_ref: (C, C)   b_ref: (C, 1)
    """
    w = w_ref[...]
    bias = b_ref[...].astype(jnp.float32)                 # (C, 1)
    nb = x_ref.shape[0]

    def one(n):
        x = x_ref[n]                                       # (C, TC)
        y = jnp.dot(w, x, preferred_element_type=jnp.float32)
        y = jnp.maximum(y + bias, 0.0)
        o_ref[n] = (x.astype(jnp.float32) + y).astype(o_ref.dtype)

    if nb <= 8:                                            # static unroll
        for n in range(nb):
            one(n)
    else:                                                  # bound code size
        def body(n, carry):
            one(n)
            return carry
        jax.lax.fori_loop(0, nb, body, 0)


def _round_up(v, m):
    return (v + m - 1) // m * m


def _largest_divisor_leq(n, cap):
    cap = max(1, min(int(cap), int(n)))
    for d in range(cap, 0, -1):
        if n % d == 0:
            return d
    return 1


def skip_connection_forward(x_nchw, w_conv, b):
    """x_nchw: [N, C, H, W]; w_conv: [C_out, C_in] = PyTorch Conv2d(1x1) weight
    (kernel dims squeezed, NOT transposed); b: [C].
    Returns x + relu(conv1x1(x)) with shape [N, C, H, W]."""
    N, C, H, W = x_nchw.shape
    assert w_conv.shape == (C, C), "expect PyTorch [C_out, C_in] 1x1 conv weight"
    assert b.shape == (C,)
    M = H * W
    itemsize = jnp.dtype(x_nchw.dtype).itemsize
    w_itemsize = jnp.dtype(w_conv.dtype).itemsize

    # Free reshape: channels -> sublanes, pixels -> lanes.  No data movement,
    # no pad, no trailing slice.
    x3 = x_nchw.reshape(N, C, M)
    b2 = b.reshape(C, 1)

    # ---- generation-aware budgets -------------------------------------------
    try:
        vmem_cap = int(pltpu.get_tpu_info().vmem_capacity_bytes)
    except Exception:  # conservative fallback sized for v7x (64 MiB)
        vmem_cap = 64 << 20
    big_vmem = vmem_cap >= (100 << 20)             # v5e / v6e: 128 MiB physical
    block_budget = (48 << 20) if big_vmem else (24 << 20)
    target_in_bytes = (4 << 20) if big_vmem else (2 << 20)

    # Per lane-column, per batch-row VMEM cost of one grid step:
    #   2x in + 2x out pipeline buffers (native dtype) + ~3 f32 temporaries
    #   (xf / acc / result) that the kernel materialises.
    per_col = C * (4 * itemsize + 3 * 4)

    # ---- lane (pixel) tile ---------------------------------------------------
    m128 = _round_up(M, 128)
    cols_by_target = max(128, (target_in_bytes // max(C * itemsize, 1)) // 128 * 128)
    cols_by_vmem = max(128, (block_budget // per_col) // 128 * 128)
    tile_cols = min(m128, cols_by_target, cols_by_vmem)
    if tile_cols >= M:
        tile_cols = M                               # full pixel axis in one block

    # ---- batch folding for small images --------------------------------------
    nb = 1
    if tile_cols == M and N > 1:
        per_image_in = C * _round_up(M, 128) * itemsize
        if per_image_in < target_in_bytes:
            nb = min(N, max(1, target_in_bytes // per_image_in))
            nb = min(nb, max(1, block_budget // (per_col * _round_up(M, 128))))
            if nb >= N:
                nb = max(1, (N + 1) // 2)           # keep >= 2 steps (v7x megacore)
            nb = _largest_divisor_leq(N, nb)

    # If the grid still collapses to a single step, split the pixel axis so
    # both v7x TensorCores get work.
    if pl.cdiv(N, nb) * pl.cdiv(M, tile_cols) < 2 and M >= 256:
        split = _round_up(pl.cdiv(M, 2), 128)
        if split < M:
            tile_cols = split

    tc_pad = _round_up(tile_cols, 128)
    grid = (pl.cdiv(N, nb), pl.cdiv(M, tile_cols))

    # ---- scoped-VMEM limit: pipeline buffers + f32 temps + resident weight ---
    est = (4 * nb * C * tc_pad * itemsize           # 2x in + 2x out buffers
           + 3 * nb * C * tc_pad * 4                # in-kernel f32 temporaries
           + 2 * (C * _round_up(C, 128) + 128) * w_itemsize  # dbl-buffered W, b
           + (2 << 20))                             # headroom
    vmem_limit = int(min(max(est, 16 << 20), (vmem_cap * 3) // 4))

    kernel = _skip_kernel_vpu if C <= _SMALL_C_MAX else _skip_kernel_mxu

    cost = pl.CostEstimate(
        flops=2 * N * M * C * C + 3 * N * M * C,
        transcendentals=0,
        bytes_accessed=2 * N * M * C * itemsize + (C * C + C) * w_itemsize,
    )

    out3 = pl.pallas_call(
        kernel,
        out_shape=jax.ShapeDtypeStruct((N, C, M), x3.dtype),
        grid_spec=pltpu.PrefetchScalarGridSpec(
            num_scalar_prefetch=0,
            grid=grid,
            in_specs=[
                pl.BlockSpec((nb, C, tile_cols), lambda n, j: (n, 0, j)),  # x tile
                # TODO(synk): for very large C a Buffered(1) weight (constant
                # index map) would free one (C, C) VMEM buffer on v7x.
                pl.BlockSpec((C, C), lambda n, j: (0, 0)),                 # weight (resident)
                pl.BlockSpec((C, 1), lambda n, j: (0, 0)),                 # bias   (resident)
            ],
            out_specs=pl.BlockSpec((nb, C, tile_cols), lambda n, j: (n, 0, j)),
        ),
        compiler_params=pltpu.CompilerParams(
            dimension_semantics=("parallel", "parallel"),
            vmem_limit_bytes=vmem_limit,
        ),
        cost_estimate=cost,
    )(x3, w_conv, b2)

    return out3.reshape(N, C, H, W)


if __name__ == "__main__":
    key = jax.random.PRNGKey(0)

    def reference(x, w, b):
        y = jnp.maximum(
            jnp.einsum('oi,nihw->nohw', w, x) + b[None, :, None, None], 0.0)
        return x + y

    def check(n, c, h, wid, kseed):
        kx, kw, kb = jax.random.split(jax.random.fold_in(key, kseed), 3)
        x = jax.random.normal(kx, (n, c, h, wid), dtype=jnp.float32)
        w = jax.random.normal(kw, (c, c), dtype=jnp.float32) * 0.1
        b = jax.random.normal(kb, (c,), dtype=jnp.float32) * 0.1
        out = jax.block_until_ready(skip_connection_forward(x, w, b))
        ref = reference(x, w, b)
        assert out.shape == x.shape
        assert jnp.allclose(out, ref, atol=1e-5, rtol=1e-5), (n, c, h, wid)

    check(2, 4, 16, 16, 0)    # primary shape: small-C unrolled VPU path
    check(2, 16, 8, 8, 1)     # C > 8: MXU path
    check(1, 4, 20, 20, 2)    # pixel count not a multiple of 128: masked edge block
    print("KERNEL_OK")
</pallas_src>

<mosaic_0001>
module attributes {stable_mosaic.version = 11 : i64} {
  func.func @_skip_kernel_vpu(%arg0: i32, %arg1: i32, %arg2: memref<1x4x256xf32, #tpu.memory_space<vmem>>, %arg3: memref<4x4xf32, #tpu.memory_space<vmem>>, %arg4: memref<4x1xf32, #tpu.memory_space<vmem>>, %arg5: memref<1x4x256xf32, #tpu.memory_space<vmem>>) attributes {dimension_semantics = [#tpu.dimension_semantics<parallel>, #tpu.dimension_semantics<parallel>], iteration_bounds = array<i64: 2, 1>, scalar_prefetch = 0 : i64, scratch_operands = 0 : i64, tpu.core_type = #tpu.core_type<tc>, window_params = [{transform_indices = @transform_0, window_bounds = array<i64: 1, 4, 256>}, {pipeline_mode = #tpu.pipeline_mode<synchronous>, transform_indices = @transform_1, window_bounds = array<i64: 4, 4>}, {pipeline_mode = #tpu.pipeline_mode<synchronous>, transform_indices = @transform_2, window_bounds = array<i64: 4, 1>}, {transform_indices = @transform_3, window_bounds = array<i64: 1, 4, 256>}]} {
    %c0 = arith.constant 0 : index
    %c0_0 = arith.constant 0 : index
    %c0_1 = arith.constant 0 : index
    %0 = vector.load %arg2[%c0, %c0_0, %c0_1] : memref<1x4x256xf32, #tpu.memory_space<vmem>>, vector<1x4x256xf32>
    %c0_2 = arith.constant 0 : index
    %c0_3 = arith.constant 0 : index
    %1 = vector.load %arg3[%c0_2, %c0_3] : memref<4x4xf32, #tpu.memory_space<vmem>>, vector<4x4xf32>
    %c0_4 = arith.constant 0 : index
    %c0_5 = arith.constant 0 : index
    %2 = vector.load %arg4[%c0_4, %c0_5] : memref<4x1xf32, #tpu.memory_space<vmem>>, vector<4x1xf32>
    %3 = vector.extract_strided_slice %1 {offsets = [0, 0], sizes = [4, 1], strides = [1, 1]} : vector<4x4xf32> to vector<4x1xf32>
    %4 = vector.extract_strided_slice %0 {offsets = [0, 0, 0], sizes = [1, 1, 256], strides = [1, 1, 1]} : vector<1x4x256xf32> to vector<1x1x256xf32>
    %5 = vector.shape_cast %3 : vector<4x1xf32> to vector<1x4x1xf32>
    %6 = vector.broadcast %5 : vector<1x4x1xf32> to vector<1x4x256xf32>
    %7 = vector.broadcast %4 : vector<1x1x256xf32> to vector<1x4x256xf32>
    %8 = arith.mulf %6, %7 : vector<1x4x256xf32>
    %9 = vector.shape_cast %2 : vector<4x1xf32> to vector<1x4x1xf32>
    %10 = vector.broadcast %9 : vector<1x4x1xf32> to vector<1x4x256xf32>
    %11 = arith.addf %10, %8 : vector<1x4x256xf32>
    %12 = vector.extract_strided_slice %1 {offsets = [0, 1], sizes = [4, 1], strides = [1, 1]} : vector<4x4xf32> to vector<4x1xf32>
    %13 = vector.extract_strided_slice %0 {offsets = [0, 1, 0], sizes = [1, 1, 256], strides = [1, 1, 1]} : vector<1x4x256xf32> to vector<1x1x256xf32>
    %14 = vector.shape_cast %12 : vector<4x1xf32> to vector<1x4x1xf32>
    %15 = vector.broadcast %14 : vector<1x4x1xf32> to vector<1x4x256xf32>
    %16 = vector.broadcast %13 : vector<1x1x256xf32> to vector<1x4x256xf32>
    %17 = arith.mulf %15, %16 : vector<1x4x256xf32>
    %18 = arith.addf %11, %17 : vector<1x4x256xf32>
    %19 = vector.extract_strided_slice %1 {offsets = [0, 2], sizes = [4, 1], strides = [1, 1]} : vector<4x4xf32> to vector<4x1xf32>
    %20 = vector.extract_strided_slice %0 {offsets = [0, 2, 0], sizes = [1, 1, 256], strides = [1, 1, 1]} : vector<1x4x256xf32> to vector<1x1x256xf32>
    %21 = vector.shape_cast %19 : vector<4x1xf32> to vector<1x4x1xf32>
    %22 = vector.broadcast %21 : vector<1x4x1xf32> to vector<1x4x256xf32>
    %23 = vector.broadcast %20 : vector<1x1x256xf32> to vector<1x4x256xf32>
    %24 = arith.mulf %22, %23 : vector<1x4x256xf32>
    %25 = arith.addf %18, %24 : vector<1x4x256xf32>
    %26 = vector.extract_strided_slice %1 {offsets = [0, 3], sizes = [4, 1], strides = [1, 1]} : vector<4x4xf32> to vector<4x1xf32>
    %27 = vector.extract_strided_slice %0 {offsets = [0, 3, 0], sizes = [1, 1, 256], strides = [1, 1, 1]} : vector<1x4x256xf32> to vector<1x1x256xf32>
    %28 = vector.shape_cast %26 : vector<4x1xf32> to vector<1x4x1xf32>
    %29 = vector.broadcast %28 : vector<1x4x1xf32> to vector<1x4x256xf32>
    %30 = vector.broadcast %27 : vector<1x1x256xf32> to vector<1x4x256xf32>
    %31 = arith.mulf %29, %30 : vector<1x4x256xf32>
    %32 = arith.addf %25, %31 : vector<1x4x256xf32>
    %cst = arith.constant 0.000000e+00 : f32
    %33 = vector.broadcast %cst : f32 to vector<1x4x256xf32>
    %34 = arith.maximumf %32, %33 : vector<1x4x256xf32>
    %35 = arith.addf %0, %34 : vector<1x4x256xf32>
    %c0_6 = arith.constant 0 : index
    %c0_7 = arith.constant 0 : index
    %c0_8 = arith.constant 0 : index
    %36 = vector.load %arg5[%c0_6, %c0_7, %c0_8] : memref<1x4x256xf32, #tpu.memory_space<vmem>>, vector<1x4x256xf32>
    tpu.vector_store %arg5[%c0_6, %c0_7, %c0_8], %35 {strides = array<i32>} : memref<1x4x256xf32, #tpu.memory_space<vmem>>, vector<1x4x256xf32>,
    return
  }
  func.func @transform_0(%arg0: i32, %arg1: i32) -> (i32, i32, i32) {
    %c0_i32 = arith.constant 0 : i32
    %c0_i32_0 = arith.constant 0 : i32
    return %arg0, %c0_i32, %arg1 : i32, i32, i32
  }
  func.func @transform_1(%arg0: i32, %arg1: i32) -> (i32, i32) {
    %c0_i32 = arith.constant 0 : i32
    %c0_i32_0 = arith.constant 0 : i32
    %c0_i32_1 = arith.constant 0 : i32
    return %c0_i32, %c0_i32_0 : i32, i32
  }
  func.func @transform_2(%arg0: i32, %arg1: i32) -> (i32, i32) {
    %c0_i32 = arith.constant 0 : i32
    %c0_i32_0 = arith.constant 0 : i32
    %c0_i32_1 = arith.constant 0 : i32
    return %c0_i32, %c0_i32_0 : i32, i32
  }
  func.func @transform_3(%arg0: i32, %arg1: i32) -> (i32, i32, i32) {
    %c0_i32 = arith.constant 0 : i32
    %c0_i32_0 = arith.constant 0 : i32
    return %arg0, %c0_i32, %arg1 : i32, i32, i32
  }
}

</mosaic_0001>

<bundles_post_ra>
// kernel: tpu_custom_call.1
= control target key start
LH: loop header
LB: loop body
LE: loop exit
PB: predicated region body
PF: predicated region fallthrough
CT: control target
= control target key end

     0   :  { %8 = vsyncpa [#allocation3], 0  ;;  %s797_s0 = inlined_call_operand.hbm [shape: f32[2,4,256], index: 0, kind: input, shape index: {}]   ;;  %s798_s1 = inlined_call_operand.vmem [shape: f32[4,4], index: 1, kind: input, shape index: {}]   ;;  %s799_s2 = inlined_call_operand.vmem [shape: f32[4,1], index: 2, kind: input, shape index: {}]   ;;  %s800_s3 = inlined_call_operand.hbm [shape: f32[2,4,256], index: 3, kind: output, shape index: {}]  }
   0x1   :  { %10 = vsyncpa [#allocation3 + $0x1], 0 }
   0x2   :  { %11 = vsyncpa [#allocation4], 0 }
   0x3   :  { %13 = vsyncpa [#allocation4 + $0x1], 0  ;;  %s653_s12 = smov 0   ;;  %s655_s13 = smov 0  }
   0x4   :  { %s657_s14 = smov 0   ;;  %s659_s15 = smov 0  }
   0x5   :  { %s661_s16 = smov 0   ;;  %s663_s17 = smov 0  }
   0x6 LB: > { %s430_s18 = sadd.s32 4294967295, %s625_s17   ;;  %s431_s19 = sadd.s32 4294967294, %s625_s17   ;;  %s625_s17 = sphi %s663_s17, %s19_s17   ;;  %s621_s16 = sphi %s661_s16, %s812_s16   ;;  %s617_s15 = sphi %s659_s15, %s811_s15   ;;  %s613_s14 = sphi %s657_s14, %s810_s14   ;;  %s609_s13 = sphi %s655_s13, %s809_s13   ;;  %s605_s12 = sphi %s653_s12, %s808_s12  }
   0x7   : > { %s31_s20 = sadd.s32 1, %s621_s16  ;;  %s40_s21 = sadd.s32 1, %s613_s14 }
   0x8   : > { %p33_p0 = scmp.ge.s32.totalorder %s31_s20, 2  ;;  %p47_p1 = scmp.ne.s32.totalorder %s613_s14, %s609_s13 }
   0x9   : > { %p48_p2 = scmp.eq.s32.totalorder %s625_s17, 0  ;;  %p53_p3 = scmp.ne.s32.totalorder %s609_s13, %s605_s12 }
   0xa   : > { %s814_s20 = smov (%p33_p0, %s31_s20), 0  ;;  %p54_p5 = scmp.eq.s32.totalorder %s430_s18, 0 }
   0xb   : > { %p694_p4 = por %p48_p2, %p47_p1  ;;  %s35_s23 = ssub.s32 %s621_s16, %s814_s20 }
   0xc   : > { %p121_p6 = scmp.eq.s32.totalorder %s430_s18, 1  ;;  %p38_p7 = scmp.eq.s32.totalorder %s35_s23, 0 }
   0xd   : > { %p700_p8 = por %p54_p5, %p53_p3  ;;  %p127_p10 = scmp.eq.s32.totalorder %s431_s19, 1 }
   0xe   : > { %p704_p9 = por %p121_p6, %p47_p1  ;;  %p459_p13 = scmp.lt.s32.totalorder %s625_s17, 2 }
   0xf   : > { %s709_s26 = scalar_select %p38_p7, %s613_s14, %s40_s21  }
  0x10   : > { %p711_p11 = por %p127_p10, %p53_p3  ;;  %s153_s28 = sand.u32 1, %s613_s14  }
  0x11   : > { %s434_s29 = sshll.u32 %s153_s28, 3  ;;  %s445_s30 = sshll.u32 %s621_s16, 7 }
  0x12   : > { %s804_s27 = scalar_select %p711_p11, 1, 0 }
  0x13   : > { %s165_s6 = scalar_lea.hbm %s797_s0, %s445_s30  ;;  %s157_s7 = scalar_lea.vmem [#allocation2], %s434_s29 }
  0x14   : > { %s167_s8 = sshll.u32 %s157_s7, 4  ;;  %p724_p0 = pnand %p459_p13, %p694_p4  ;;  %s168_s8 = int_to_ptr.vmem [resolvable:$true] %s167_s8 }
  0x15   : > { %p437_p1 = scmp.ge.s32.totalorder %s625_s17, 1  ;;  %p172_p2 = scmp.lt.s32.totalorder %s625_s17, 3 }
  0x16   : > { %s154_s10 = scalar_lea.sflag [#allocation3], %s153_s28  ;;  %p519_p3 = pneg %p724_p0 }
  0x17   : > { %s530_s11 = scalar_lea.vmem %s168_s8, 128  ;;  %s627_s18 = smov [#allocation2]  }
  0x18   : > { %p531_p5 = scmp.ne.s32.totalorder %s168_s8, %s530_s11  ;;  %s535_s19 = sshll.u32 %s627_s18, 4  ;;  %s536_s19 = int_to_ptr.vmem [resolvable:$false] %s535_s19 }
  0x19   : > { %s537_s21 = scalar_lea.vmem %s536_s19, 256  ;;  %p538_p10 = scmp.lt.s32.totalorder %s168_s8, %s536_s19 }
  0x1a   : > { %p533_p6 = pnand %p531_p5, %p519_p3  ;;  %p539_p12 = scmp.lt.s32.totalorder %s537_s21, %s530_s11 }
  0x1c   : > { %p534_p7 = pneg %p533_p6  ;;  %p540_p4 = por %p539_p12, %p538_p10 }
  0x1e   : > { %p541_p13 = pnand %p540_p4, %p534_p7 }
  0x20   : > { %544 = shalt.err (!%p541_p13)
}
  0x21   : > { %454 = dma.hbm_to_vmem [thread:$0]  (!%p724_p0), %s165_s6, 128, %s168_s8, %s154_s10  }
  0x22   : > { %p173_p11 = pnand %p437_p1, %p172_p2 }
  0x23   : > { %s739_s22 = sand.u32 (!%p173_p11), 1, %s609_s13  }
  0x24   : > { %176 = sbr.rel (%p173_p11) target bundleno = 200 (0xc8), region = 32  ;;  %s438_s23 = sshll.u32 (!%p173_p11), %s739_s22, 3 }
  0x25   : > { %s179_s28 = scalar_lea.sflag (!%p173_p11), [#allocation3], %s739_s22  ;;  %s182_s29 = scalar_lea.vmem (!%p173_p11), [#allocation2], %s438_s23 }
  0x29   : > { %596 = dma.done.wait (%p700_p8), %s179_s28, 128  }
  0x2a   : > { %598 = vsyncadd (%p700_p8), %s179_s28, 4294967168  ;;  %v628_v0 = vmov 0   ;;  %v629_v1 = vmov 1   ;;  %v208_v2 = vld [vmem:[%s798_s1] sm:$0xf]  ;;  %v630_v4 = vmov 2   ;;  %v216_v6 = vlaneseq }
  0x2b   : > { %513 = vset.pattern.permute.xlu0 %v628_v0  ;;  %514 = vset.pattern.permute.xlu1 %v629_v1  ;;  %v209_v3 = vld [vmem:[%s799_s2] sm:$0xf]  ;;  %v631_v5 = vmov 3   ;;  %s446_s24 = sshll.u32 %s617_s15, 7  ;;  %s204_s7 = scalar_lea.vmem [#allocation5], %s438_s23 }
  0x2c   : > { %212 = vperm.xlu0 %513, %v208_v2   ;;  %244 = vperm.xlu1 %514, %v208_v2   ;;  %v217_v7 = vshrl.u32 %v216_v6, 7  ;;  %v207_v10 = vld [vmem:[%s182_s29] sm:$0xff]  ;;  %s346_s8 = sshll.u32 %s204_s7, 4  ;;  %s344_s11 = scalar_lea.hbm %s800_s3, %s446_s24  ;;  %s347_s8 = int_to_ptr.vmem [resolvable:$true] %s346_s8 }
  0x2d   : > { %s330_s18 = scalar_lea.sflag [#allocation4], %s739_s22  ;;  %s545_s19 = scalar_lea.vmem %s347_s8, 128 }
  0x2e   : > { %v218_v8 = vsub.s32 0, %v217_v7  ;;  %v222_v9 = vsub.s32 4, %v217_v7  ;;  %v249_v11 = vsub.s32 1, %v217_v7  ;;  %v253_v12 = vsub.s32 5, %v217_v7  ;;  %p546_p8 = scmp.ne.s32.totalorder %s347_s8, %s545_s19  ;;  %s632_s21 = smov [#allocation5]  }
  0x2f   : > { %v275_v13 = vsub.s32 2, %v217_v7  ;;  %v279_v14 = vsub.s32 6, %v217_v7  ;;  %v301_v21 = vsub.s32 3, %v217_v7  ;;  %v305_v22 = vsub.s32 7, %v217_v7  ;;  %s549_s28 = sshll.u32 %s632_s21, 4  ;;  %s550_s28 = int_to_ptr.vmem [resolvable:$false] %s549_s28 }
  0x30   : > { %238 = vperm.xlu0 %513, %v209_v3   ;;  %515 = vset.pattern.permute.xlu1 %v630_v4  ;;  %v219_v15 = vrot.slane %v207_v10, %v218_v8  ;;  %v223_v16 = vrot.slane %v207_v10, %v222_v9  ;;  %v250_v17 = vrot.slane %v207_v10, %v249_v11  ;;  %p547_p11 = pnand %p546_p8, %p704_p9  ;;  %s551_s15 = scalar_lea.vmem %s550_s28, 256 }
  0x31   : > { %270 = vperm.xlu1 %515, %v208_v2   ;;  %v254_v18 = vrot.slane %v207_v10, %v253_v12  ;;  %v276_v19 = vrot.slane %v207_v10, %v275_v13  ;;  %v280_v20 = vrot.slane %v207_v10, %v279_v14  ;;  %v302_v31 = vrot.slane %v207_v10, %v301_v21  ;;  %p552_p0 = scmp.lt.s32.totalorder %s347_s8, %s550_s28  ;;  %p553_p1 = scmp.lt.s32.totalorder %s551_s15, %s545_s19 }
  0x32   : > { %v229_v23 = vrot.slane %v219_v15, %v218_v8  ;;  %v233_v24 = vrot.slane %v223_v16, %v218_v8  ;;  %v260_v27 = vrot.slane %v250_v17, %v249_v11  ;;  %v306_v32 = vrot.slane %v207_v10, %v305_v22  ;;  %p548_p12 = pneg %p547_p11 }
  0x33   : > { %v264_v28 = vrot.slane %v254_v18, %v249_v11  ;;  %v286_v29 = vrot.slane %v276_v19, %v275_v13  ;;  %v290_v30 = vrot.slane %v280_v20, %v275_v13  ;;  %v312_v43 = vrot.slane %v302_v31, %v301_v21  ;;  %p554_p2 = por %p553_p1, %p552_p0 }
  0x34   : > { %516 = vset.pattern.permute.xlu0 %v631_v5  ;;  %v316_v44 = vrot.slane %v306_v32, %v301_v21 }
  0x35   : > { %296 = vperm.xlu0 %516, %v208_v2   ;;  %p555_p3 = pnand %p554_p2, %p548_p12 }
  0xa7   : > { %v213_v25 = vpop.permute.xlu0 %212  ;;  %v245_v26 = vpop.permute.xlu1 %244 }
  0xa8   : > { %v234_v33 = vmul.f32 %v229_v23, %v213_v25  ;;  %v235_v34 = vmul.f32 %v233_v24, %v213_v25  ;;  %v265_v36 = vmul.f32 %v260_v27, %v245_v26  ;;  %v266_v37 = vmul.f32 %v264_v28, %v245_v26 }
  0xab   : > { %v239_v35 = vpop.permute.xlu0 %238 }
  0xac   : > { %v241_v38 = vadd.f32 %v239_v35, %v234_v33  ;;  %v242_v39 = vadd.f32 %v239_v35, %v235_v34  ;;  %v271_v40 = vpop.permute.xlu1 %270 }
  0xad   : > { %v291_v41 = vmul.f32 %v286_v29, %v271_v40  ;;  %v292_v42 = vmul.f32 %v290_v30, %v271_v40 }
  0xae   : > { %v267_v45 = vadd.f32 %v265_v36, %v241_v38  ;;  %v268_v46 = vadd.f32 %v266_v37, %v242_v39 }
  0xb0   : > { %v293_v47 = vadd.f32 %v291_v41, %v267_v45  ;;  %v294_v48 = vadd.f32 %v292_v42, %v268_v46  ;;  %v297_v49 = vpop.permute.xlu0 %296 }
  0xb1   : > { %v317_v50 = vmul.f32 %v312_v43, %v297_v49  ;;  %v318_v51 = vmul.f32 %v316_v44, %v297_v49 }
  0xb3   : > { %v319_v52 = vadd.f32 %v317_v50, %v293_v47  ;;  %v320_v53 = vadd.f32 %v318_v51, %v294_v48 }
  0xb5   : > { %v321_v54 = vmax.f32 %v319_v52, 0.0  ;;  %v322_v55 = vmax.f32 %v320_v53, 0.0 }
  0xb7   : > { %v325_v56 = vcombine.low %v321_v54, %v322_v55 }
  0xb9   : > { %v327_v57 = vadd.f32 %v325_v56, %v207_v10 }
  0xbb   : > { %328 = vst [vmem:[%s204_s7] sm:$0xff] %v327_v57 }
  0xbc   : > { %558 = shalt.err (!%p555_p3)
}
  0xbd   : > { %s559_s23 = scalar_lea.hbm %s344_s11, 128  ;;  %s563_s30 = scalar_lea.hbm %s800_s3, 256 }
  0xbe   : > { %p560_p5 = scmp.ne.s32.totalorder %s344_s11, %s559_s23  ;;  %p564_p10 = scmp.lt.s32.totalorder %s344_s11, %s800_s3 }
  0xbf   : > { %p565_p4 = scmp.lt.s32.totalorder %s563_s30, %s559_s23 }
  0xc0   : > { %p561_p6 = pnand %p560_p5, %p704_p9 }
  0xc1   : > { %p566_p13 = por %p565_p4, %p564_p10 }
  0xc2   : > { %p562_p7 = pneg %p561_p6 }
  0xc4   : > { %p567_p8 = pnand %p566_p13, %p562_p7 }
  0xc6   : > { %570 = shalt.err (!%p567_p8)
}
  0xc7   : > { %449 = dma.vmem_to_hbm [thread:$0]  (%p704_p9), %s347_s8, 128, %s344_s11, %s330_s18  }
  0xc8 PF: > { %s358_s6 = sand.u32 1, %s605_s12   ;;  %p806_p11 = scmp.ne.s32.totalorder %s804_s27, 0 }
  0xc9   : > { %p807_p12 = scmp.ge.s32.totalorder %s625_s17, 2  ;;  %s359_s24 = scalar_lea.sflag [#allocation4], %s358_s6 }
  0xcb   : > { %p456_p0 = pnand %p807_p12, %p806_p11 }
  0xcd   : > { %p457_p1 = pneg %p456_p0 }
  0xcf   : > { %600 = dma.done.wait (%p457_p1), %s359_s24, 128  }
  0xd0   : > { %602 = vsyncadd (%p457_p1), %s359_s24, 4294967168  ;;  %s19_s17 = sadd.s32 1, %s625_s17   ;;  %s808_s12 = smov %s609_s13 }
  0xd1   : > { %p16_p2 = scmp.ge.s32.totalorder %s19_s17, 4   ;;  %s809_s13 = smov %s613_s14 }
  0xd2   : > { %s810_s14 = smov %s709_s26  ;;  %s811_s15 = smov %s621_s16 }
  0xd3   : > { %s812_s16 = smov %s814_s20  ;;  %18 = sbr.rel (!%p16_p2) target bundleno = 6 (0x6), region = 77 }
  0xd8   :  { %364 = vsyncpa [#allocation3], 1 }
  0xd9   :  { %366 = vsyncpa [#allocation3 + $0x1], 1 }
  0xda   :  { %367 = vsyncpa [#allocation4], 1 }
  0xdb   :  { %369 = vsyncpa [#allocation4 + $0x1], 1 }

</bundles_post_ra>
